<compile_context>
chip_gen: v7x
topology: tpu7x:2x2x1
jax: 0.10.0
libtpu: 0.0.40
codegen_flags: <defaults>
</compile_context>

<pallas_src>
import functools

import jax
import jax.numpy as jnp
from jax.experimental import pallas as pl
from jax.experimental.pallas import tpu as pltpu


def _mlp_kernel(x_ref, wgu_ref, wd_ref, o_ref, acc_ref, *, tile_i):
    # x_ref:   (tm, H)            bf16
    # wgu_ref: (H, 2*tile_i)      bf16   columns = [gate_tile | up_tile]
    # wd_ref:  (tile_i, H)        bf16
    # o_ref:   (tm, H)            out dtype
    # acc_ref: (tm, H)            f32 scratch, resident across the I axis
    @pl.when(pl.program_id(1) == 0)
    def _():
        acc_ref[...] = jnp.zeros_like(acc_ref)

    x = x_ref[...]
    # Fused gate|up projection: one MXU pass over a 2*tile_i-wide RHS.
    gu = jnp.dot(x, wgu_ref[...], preferred_element_type=jnp.float32)
    gate = gu[:, :tile_i]
    up = gu[:, tile_i:]
    hidden = (gate * jax.nn.sigmoid(gate)) * up          # SiLU(gate) * up, f32

    # Partial down-projection for this I-slice, accumulated in f32 VMEM.
    acc_ref[...] += jnp.dot(hidden.astype(wd_ref.dtype), wd_ref[...],
                            preferred_element_type=jnp.float32)

    @pl.when(pl.program_id(1) == pl.num_programs(1) - 1)
    def _():
        o_ref[...] = acc_ref[...].astype(o_ref.dtype)


def _largest_divisor_tile(total, desired, align):
    """Largest divisor of `total` that is <= desired and a multiple of `align`,
    falling back to the full extent (always legal as a block dim)."""
    if total <= desired:
        return total
    t = (desired // align) * align
    while t >= align:
        if total % t == 0:
            return t
        t -= align
    return total


def prepare_mlp_weights(w_gate, w_up, w_down, *, tile_i, dtype=jnp.bfloat16):
    """One-time weight preparation (do this OUTSIDE the hot path):
      - transpose to [in, out] so the kernel computes plain x @ W,
      - cast to the MXU compute dtype (bf16),
      - fuse gate & up per I-tile into one [H, 2*I] matrix whose i-th block of
        2*tile_i columns is [gate_tile_i | up_tile_i]."""
    I, H = w_gate.shape
    assert I % tile_i == 0
    n_i = I // tile_i
    wg_t = w_gate.T.astype(dtype)                     # [H, I]
    wu_t = w_up.T.astype(dtype)                       # [H, I]
    wgu = jnp.concatenate(
        [wg_t.reshape(H, n_i, tile_i), wu_t.reshape(H, n_i, tile_i)],
        axis=2).reshape(H, 2 * I)                     # [H, 2I], per-tile fused
    wd_t = w_down.T.astype(dtype)                     # [I, H]
    return wgu, wd_t


def slm_mlp(x, wgu, wd_t, *, tile_m=256, tile_i, compute_dtype=jnp.bfloat16):
    """x: [B, S, H]. wgu: [H, 2*I] fused (from prepare_mlp_weights). wd_t: [I, H]."""
    B, S, H = x.shape
    I, _ = wd_t.shape
    M = B * S
    out_dtype = x.dtype

    n_i = I // tile_i
    assert n_i * tile_i == I, "tile_i must divide I"

    x2d = x.reshape(M, H).astype(compute_dtype)

    # Token tiling: pad M up to a multiple of the tile (padded rows discarded).
    tm = min(tile_m, M)
    n_m = pl.cdiv(M, tm)
    m_pad = n_m * tm
    if m_pad != M:
        x2d = jnp.pad(x2d, ((0, m_pad - M), (0, 0)))

    itemsize = lambda a: jnp.dtype(a.dtype).itemsize
    cost = pl.CostEstimate(
        flops=6 * m_pad * H * I,                       # 2*M*H*2I (gate|up) + 2*M*I*H (down)
        transcendentals=m_pad * I,                     # sigmoid
        bytes_accessed=(x2d.size * itemsize(x2d)
                        + wgu.size * itemsize(wgu)
                        + wd_t.size * itemsize(wd_t)
                        + m_pad * H * jnp.dtype(out_dtype).itemsize),
    )

    kernel = functools.partial(_mlp_kernel, tile_i=tile_i)

    out2d = pl.pallas_call(
        kernel,
        out_shape=jax.ShapeDtypeStruct((m_pad, H), out_dtype),
        grid_spec=pltpu.PrefetchScalarGridSpec(
            num_scalar_prefetch=0,
            grid=(n_m, n_i),                           # reduction axis (I) last
            in_specs=[
                pl.BlockSpec((tm, H), lambda m, i: (m, 0)),           # x tile
                pl.BlockSpec((H, 2 * tile_i), lambda m, i: (0, i)),   # [gate|up] slice
                pl.BlockSpec((tile_i, H), lambda m, i: (i, 0)),       # down slice
            ],
            out_specs=pl.BlockSpec((tm, H), lambda m, i: (m, 0)),     # resident over I
            scratch_shapes=[pltpu.VMEM((tm, H), jnp.float32)],        # f32 accumulator
        ),
        compiler_params=pltpu.CompilerParams(
            dimension_semantics=("parallel", "arbitrary"),
            vmem_limit_bytes=32 * 1024 * 1024),
        cost_estimate=cost,
    )(x2d, wgu, wd_t)

    return out2d[:M].reshape(B, S, H)


def _reference(x, w_gate, w_up, w_down):
    gate = jnp.einsum("bsh,ih->bsi", x, w_gate)
    up = jnp.einsum("bsh,ih->bsi", x, w_up)
    hidden = jax.nn.silu(gate) * up
    return jnp.einsum("bsi,hi->bsh", hidden, w_down)


if __name__ == "__main__":
    # Small config: batch=2, seq=8, hidden=32, intermediate=64
    B, S, H, I = 2, 8, 32, 64

    key = jax.random.PRNGKey(0)
    kx, kg, ku, kd = jax.random.split(key, 4)

    x = jax.random.normal(kx, (B, S, H), dtype=jnp.float32)
    # nn.Linear-layout weights ([out, in]), scale ~ 1/sqrt(fan_in)
    w_gate = jax.random.uniform(kg, (I, H), jnp.float32, -1.0, 1.0) / jnp.sqrt(H)
    w_up = jax.random.uniform(ku, (I, H), jnp.float32, -1.0, 1.0) / jnp.sqrt(H)
    w_down = jax.random.uniform(kd, (H, I), jnp.float32, -1.0, 1.0) / jnp.sqrt(I)

    # Production-oriented tile choice; degenerates to full-extent blocks here.
    tile_i = _largest_divisor_tile(I, desired=512, align=64)

    # One-time weight prep (transpose + bf16 cast + gate/up fuse), outside hot path.
    wgu, wd_t = prepare_mlp_weights(w_gate, w_up, w_down, tile_i=tile_i)

    out = slm_mlp(x, wgu, wd_t, tile_m=256, tile_i=tile_i)
    out = jax.block_until_ready(out)

    ref = _reference(x, w_gate, w_up, w_down)
    assert out.shape == (B, S, H)
    assert out.dtype == x.dtype
    # bf16 MXU path vs f32 reference -> loose tolerance.
    max_err = float(jnp.max(jnp.abs(out - ref)))
    assert jnp.allclose(out, ref, atol=2e-2, rtol=2e-2), (
        f"mismatch vs reference (max abs err {max_err})")

    print("KERNEL_OK")
</pallas_src>

<mosaic_0001>
module attributes {stable_mosaic.version = 11 : i64} {
  func.func @_mlp_kernel(%arg0: i32, %arg1: i32, %arg2: memref<16x32xbf16, #tpu.memory_space<vmem>>, %arg3: memref<32x128xbf16, #tpu.memory_space<vmem>>, %arg4: memref<64x32xbf16, #tpu.memory_space<vmem>>, %arg5: memref<16x32xf32, #tpu.memory_space<vmem>>, %arg6: memref<16x32xf32, #tpu.memory_space<vmem>>) attributes {dimension_semantics = [#tpu.dimension_semantics<parallel>, #tpu.dimension_semantics<arbitrary>], iteration_bounds = array<i64: 1, 1>, scalar_prefetch = 0 : i64, scratch_operands = 1 : i64, tpu.core_type = #tpu.core_type<tc>, window_params = [{transform_indices = @transform_0, window_bounds = array<i64: 16, 32>}, {transform_indices = @transform_1, window_bounds = array<i64: 32, 128>}, {transform_indices = @transform_2, window_bounds = array<i64: 64, 32>}, {transform_indices = @transform_3, window_bounds = array<i64: 16, 32>}]} {
    %c0_i32 = arith.constant 0 : i32
    %0 = arith.cmpi eq, %arg1, %c0_i32 : i32
    %1 = arith.extui %0 : i1 to i32
    %c0_i32_0 = arith.constant 0 : i32
    %2 = arith.cmpi ne, %1, %c0_i32_0 : i32
    scf.if %2 {
      %cst_14 = arith.constant 0.000000e+00 : f32
      %24 = vector.broadcast %cst_14 : f32 to vector<16x32xf32>
      %c0_15 = arith.constant 0 : index
      %c0_16 = arith.constant 0 : index
      %25 = vector.load %arg6[%c0_15, %c0_16] : memref<16x32xf32, #tpu.memory_space<vmem>>, vector<16x32xf32>
      tpu.vector_store %arg6[%c0_15, %c0_16], %24 {strides = array<i32>} : memref<16x32xf32, #tpu.memory_space<vmem>>, vector<16x32xf32>,
    } else {
    }
    %c0 = arith.constant 0 : index
    %c0_1 = arith.constant 0 : index
    %3 = vector.load %arg2[%c0, %c0_1] : memref<16x32xbf16, #tpu.memory_space<vmem>>, vector<16x32xbf16>
    %c0_2 = arith.constant 0 : index
    %c0_3 = arith.constant 0 : index
    %4 = vector.load %arg3[%c0_2, %c0_3] : memref<32x128xbf16, #tpu.memory_space<vmem>>, vector<32x128xbf16>
    %cst = arith.constant dense<0.000000e+00> : vector<16x128xf32>
    %5 = tpu.matmul %3, %4, %cst {dimension_numbers = #tpu.dot_dimension_numbers<[1], [0], [0], [1], [0, 0, 1, 1], [], []>} : vector<16x32xbf16>, vector<32x128xbf16>, vector<16x128xf32> -> vector<16x128xf32>
    %6 = vector.extract_strided_slice %5 {offsets = [0, 0], sizes = [16, 64], strides = [1, 1]} : vector<16x128xf32> to vector<16x64xf32>
    %7 = vector.extract_strided_slice %5 {offsets = [0, 64], sizes = [16, 64], strides = [1, 1]} : vector<16x128xf32> to vector<16x64xf32>
    %8 = arith.negf %6 : vector<16x64xf32>
    %9 = math.exp %8 : vector<16x64xf32>
    %cst_4 = arith.constant 1.000000e+00 : f32
    %10 = vector.broadcast %cst_4 : f32 to vector<16x64xf32>
    %11 = arith.addf %10, %9 : vector<16x64xf32>
    %12 = arith.divf %10, %11 : vector<16x64xf32>
    %13 = arith.mulf %6, %12 : vector<16x64xf32>
    %14 = arith.mulf %13, %7 : vector<16x64xf32>
    %c0_5 = arith.constant 0 : index
    %c0_6 = arith.constant 0 : index
    %15 = vector.load %arg6[%c0_5, %c0_6] : memref<16x32xf32, #tpu.memory_space<vmem>>, vector<16x32xf32>
    %16 = arith.truncf %14 : vector<16x64xf32> to vector<16x64xbf16>
    %c0_7 = arith.constant 0 : index
    %c0_8 = arith.constant 0 : index
    %17 = vector.load %arg4[%c0_7, %c0_8] : memref<64x32xbf16, #tpu.memory_space<vmem>>, vector<64x32xbf16>
    %cst_9 = arith.constant dense<0.000000e+00> : vector<16x32xf32>
    %18 = tpu.matmul %16, %17, %cst_9 {dimension_numbers = #tpu.dot_dimension_numbers<[1], [0], [0], [1], [0, 0, 1, 1], [], []>} : vector<16x64xbf16>, vector<64x32xbf16>, vector<16x32xf32> -> vector<16x32xf32>
    %19 = arith.addf %15, %18 : vector<16x32xf32>
    %c0_10 = arith.constant 0 : index
    %c0_11 = arith.constant 0 : index
    %20 = vector.load %arg6[%c0_10, %c0_11] : memref<16x32xf32, #tpu.memory_space<vmem>>, vector<16x32xf32>
    tpu.vector_store %arg6[%c0_10, %c0_11], %19 {strides = array<i32>} : memref<16x32xf32, #tpu.memory_space<vmem>>, vector<16x32xf32>,
    %c0_i32_12 = arith.constant 0 : i32
    %21 = arith.cmpi eq, %arg1, %c0_i32_12 : i32
    %22 = arith.extui %21 : i1 to i32
    %c0_i32_13 = arith.constant 0 : i32
    %23 = arith.cmpi ne, %22, %c0_i32_13 : i32
    scf.if %23 {
      %c0_14 = arith.constant 0 : index
      %c0_15 = arith.constant 0 : index
      %24 = vector.load %arg6[%c0_14, %c0_15] : memref<16x32xf32, #tpu.memory_space<vmem>>, vector<16x32xf32>
      %c0_16 = arith.constant 0 : index
      %c0_17 = arith.constant 0 : index
      %25 = vector.load %arg5[%c0_16, %c0_17] : memref<16x32xf32, #tpu.memory_space<vmem>>, vector<16x32xf32>
      tpu.vector_store %arg5[%c0_16, %c0_17], %24 {strides = array<i32>} : memref<16x32xf32, #tpu.memory_space<vmem>>, vector<16x32xf32>,
    } else {
    }
    return
  }
  func.func @transform_0(%arg0: i32, %arg1: i32) -> (i32, i32) {
    %c0_i32 = arith.constant 0 : i32
    %c0_i32_0 = arith.constant 0 : i32
    return %arg0, %c0_i32 : i32, i32
  }
  func.func @transform_1(%arg0: i32, %arg1: i32) -> (i32, i32) {
    %c0_i32 = arith.constant 0 : i32
    %c0_i32_0 = arith.constant 0 : i32
    return %c0_i32, %arg1 : i32, i32
  }
  func.func @transform_2(%arg0: i32, %arg1: i32) -> (i32, i32) {
    %c0_i32 = arith.constant 0 : i32
    %c0_i32_0 = arith.constant 0 : i32
    return %arg1, %c0_i32 : i32, i32
  }
  func.func @transform_3(%arg0: i32, %arg1: i32) -> (i32, i32) {
    %c0_i32 = arith.constant 0 : i32
    %c0_i32_0 = arith.constant 0 : i32
    return %arg0, %c0_i32 : i32, i32
  }
}

</mosaic_0001>

<bundles_post_ra>
// kernel: tpu_custom_call.1
= control target key start
LH: loop header
LB: loop body
LE: loop exit
PB: predicated region body
PF: predicated region fallthrough
CT: control target
= control target key end

     0   :  { %v306_v1 = vmov 0.0   ;;  %vm307_vm0 = vmmov 0   ;;  %vm20_vm1 = vcmask 261120   ;;  %s372_s0 = inlined_call_operand.vmem [shape: bf16[16,32], index: 0, kind: input, shape index: {}]   ;;  %s373_s1 = inlined_call_operand.vmem [shape: bf16[32,128], index: 1, kind: input, shape index: {}]   ;;  %s374_s2 = inlined_call_operand.vmem [shape: bf16[64,32], index: 2, kind: input, shape index: {}]   ;;  %s375_s3 = inlined_call_operand.hbm [shape: f32[16,32], index: 3, kind: output, shape index: {}]  }
   0x1   :  { %v267_v0 = vld [vmem:[%s373_s1] sm:$0xff]   ;;  %241 = vmatprep.subr.bf16.mxu0 %v306_v1  ;;  %249 = vmatprep.subr.bf16.mxu1 %v306_v1  ;;  %v268_v2 = vld [vmem:[%s373_s1 + $0x8] sm:$0xff]   ;;  %21 = vst.msk [vmem:[#allocation2] sm:$0xff] %vm20_vm1, %v306_v1  ;;  %22 = vst.msk [vmem:[#allocation2 + $0x8] sm:$0xff] %vm20_vm1, %v306_v1 }
   0x2   :  { %242 = vmatpush3.bf16.msra.mxu0 %v267_v0  ;;  %245 = vmatprep.mubr.msk.bf16.mxu0 %vm307_vm0, %v306_v1  ;;  %v269_v3 = vld [vmem:[%s372_s0] sm:$0xff]  }
   0x3   :  { %243 = vmatprep.subr.bf16.mxu0 %v306_v1  ;;  %257 = vmatprep.mubr.msk.bf16.mxu1 %vm307_vm0, %v306_v1 }
   0x4   :  { %8 = vsyncpa [#allocation4], 0  ;;  %v270_v4 = vld [vmem:[%s374_s2] sm:$0xff]   ;;  %v271_v5 = vld [vmem:[%s374_s2 + $0x8] sm:$0xff]   ;;  %s308_s24 = smov 64   ;;  %vm150_vm2 = vcmask 523264  }
   0x5   :  { %250 = vmatpush3.bf16.msra.mxu1 %v270_v4  ;;  %v272_v6 = vld [vmem:[%s374_s2 + $0x10] sm:$0xff]   ;;  %v273_v7 = vld [vmem:[%s374_s2 + $0x18] sm:$0xff]   ;;  %s309_s2 = smov [#allocation3]  }
   0x6   :  { %244 = vmatpush3.bf16.msra.mxu0 %v268_v2  ;;  %251 = vmatprep.subr.bf16.mxu1 %v306_v1  ;;  %s211_s25 = sshll.u32 %s309_s2, 4  ;;  %s212_s25 = int_to_ptr.vmem [resolvable:$true] %s211_s25 }
   0x7   :  { %s282_s26 = scalar_lea.vmem %s212_s25, 256  ;;  %p287_p1 = scmp.lt.s32.totalorder %s212_s25, %s212_s25 }
   0x8   :  { %v115_v27 = vld [vmem:[#allocation2] sm:$0xff]  ;;  %v116_v29 = vld [vmem:[#allocation2 + $0x8] sm:$0xff]  ;;  %p283_p0 = scmp.ne.s32.totalorder %s212_s25, %s282_s26  ;;  %p288_p2 = scmp.lt.s32.totalorder %s282_s26, %s282_s26 }
   0x9   :  { %246 = vmatmul.mubr.msk.bf16.vlgmr.msra.gmra.mrb[0].mxu0 %vm20_vm1, %v269_v3  ;;  %252 = vmatpush3.bf16.msra.mxu1 %v271_v5 }
   0xa   :  { %253 = vmatprep.subr.bf16.mxu1 %v306_v1  ;;  %p289_p3 = por %p288_p2, %p287_p1 }
   0xc   :  { %p290_p4 = pnand %p289_p3, %p283_p0 }
   0xd   :  { %254 = vmatpush3.bf16.msra.mxu1 %v272_v6 }
   0xe   :  { %255 = vmatprep.subr.bf16.mxu1 %v306_v1 }
  0x11   :  { %256 = vmatpush3.bf16.msra.mxu1 %v273_v7 }
  0xdc   :  { %v84_v8 = vpop.f32.mrb[0].mxu0 }
  0xdd   :  { %107 = vrot.lane.b32.xlu0 %v84_v8, %s308_s24  ;;  %v247_v9 = vpop.f32.mrb[1].mxu0  ;;  %v226_v12 = vmul.f32 -1.442695, %v84_v8 }
  0xde   :  { %v87_v10 = vpop.f32.mrb[2].mxu0 }
  0xdf   :  { %v248_v11 = vpop.f32.mrb[3].mxu0  ;;  %v227_v13 = vmul.f32 -1.442695, %v87_v10  ;;  %274 = vpow2.f32 %v226_v12 }
  0xe1   :  { %109 = vrot.lane.b32.xlu0 %v87_v10, %s308_s24  ;;  %276 = vpow2.f32 %v227_v13 }
  0xe9   :  { %v275_v14 = vpop.eup %274 }
  0xea   :  { %v97_v16 = vadd.f32 1.0, %v275_v14 }
  0xeb   :  { %v277_v15 = vpop.eup %276 }
  0xec   :  { %v98_v17 = vadd.f32 1.0, %v277_v15  ;;  %278 = vrcp.f32 %v97_v16 }
  0xee   :  { %280 = vrcp.f32 %v98_v17 }
  0xf6   :  { %v279_v18 = vpop.eup %278 }
  0xf7   :  { %v103_v21 = vmul.f32 %v279_v18, %v84_v8 }
  0xf8   :  { %v281_v19 = vpop.eup %280 }
  0xf9   :  { %v104_v22 = vmul.f32 %v281_v19, %v87_v10 }
 0x14f   :  { %v108_v20 = vpop.permute.xlu0 %107 }
 0x150   :  { %v113_v24 = vmul.f32 %v108_v20, %v103_v21 }
 0x153   :  { %v110_v23 = vpop.permute.xlu0 %109 }
 0x154   :  { %v114_v25 = vmul.f32 %v110_v23, %v104_v22 }
 0x156   :  { %v117_v26 = vpack.c.bf16 %v114_v25, %v113_v24 }
 0x158   :  { %258 = vmatmul.mubr.msk.bf16.vlgmr.msra.gmra.mrb[0].mxu1 %vm150_vm2, %v117_v26 }
 0x22b   :  { %v188_v28 = vpop.f32.mrb[0].mxu1 }
 0x22c   :  { %v195_v30 = vadd.f32 %v188_v28, %v115_v27  ;;  %v259_v31 = vpop.f32.mrb[1].mxu1 }
 0x22d   :  { %v191_v32 = vpop.f32.mrb[2].mxu1 }
 0x22e   :  { %197 = vst.msk [vmem:[#allocation2] sm:$0xff] %vm20_vm1, %v195_v30  ;;  %v196_v33 = vadd.f32 %v191_v32, %v116_v29  ;;  %v260_v34 = vpop.f32.mrb[3].mxu1 }
 0x230   :  { %198 = vst.msk [vmem:[#allocation2 + $0x8] sm:$0xff] %vm20_vm1, %v196_v33 }
 0x235   :  { %v202_v35 = vld [vmem:[#allocation2] sm:$0xff] }
 0x236   :  { %204 = vst.msk [vmem:[#allocation3] sm:$0xff] %vm20_vm1, %v202_v35 }
 0x237   :  { %v203_v36 = vld [vmem:[#allocation2 + $0x8] sm:$0xff] }
 0x238   :  { %205 = vst.msk [vmem:[#allocation3 + $0x8] sm:$0xff] %vm20_vm1, %v203_v36 }
 0x239   :  { %293 = shalt.err (!%p290_p4)
}
 0x23a   :  { %s294_s29 = scalar_lea.hbm %s375_s3, 256 }
 0x23b   :  { %p295_p5 = scmp.ne.s32.totalorder %s375_s3, %s294_s29  ;;  %p298_p6 = scmp.lt.u32.totalorder %s294_s29, %s375_s3 }
 0x23d   :  { %p300_p7 = pnand %p298_p6, %p295_p5 }
 0x23f   :  { %303 = shalt.err (!%p300_p7)
}
 0x240   :  { %s310_s7 = smov 128   ;;  %s311_s8 = smov 8  }
 0x241   :  { %217 = dma.vmem_to_hbm [thread:$0]  %s212_s25, 256, %s375_s3, [#allocation4], %s310_s7, %s310_s7, %s311_s8  }
 0x242   :  { %304 = dma.done.wait [#allocation4], 256  }
 0x243   :  { %305 = vsyncadd [#allocation4], 4294967040 }
 0x244   :  { %221 = vsyncpa [#allocation4], 1 }

</bundles_post_ra>
